<compile_context>
chip_gen: v7x
topology: tpu7x:2x2x1
jax: 0.10.0
libtpu: 0.0.40
codegen_flags: <defaults>
</compile_context>

<pallas_src>
import jax
import jax.numpy as jnp
from jax.experimental import pallas as pl
from jax.experimental.pallas import tpu as pltpu


def _round_up(x, m):
    return ((x + m - 1) // m) * m


def _align_down(x, m):
    return (x // m) * m


def _vmem_capacity_bytes():
    """Physical per-TensorCore VMEM (128 MiB on v5e/v6e, 64 MiB on v7x)."""
    try:
        info = pltpu.get_tpu_info()
        cap = getattr(info, "vmem_capacity_bytes", None)
        if cap:
            return int(cap)
    except Exception:
        pass
    return 64 * 1024 * 1024  # conservative fallback (v7x floor)


# ----------------------------------------------------------------------------
# Kernels
# ----------------------------------------------------------------------------

def _token_mlp_resident_kernel(x_ref, w1_ref, b1_ref, w2_ref, b2_ref, o_ref):
    # x_ref: (tm, Hp); w1_ref: (Hp, Ip); b1_ref: (1, Ip) f32;
    # w2_ref: (Ip, Hp); b2_ref: (1, Hp) f32; o_ref: (tm, Hp)
    x = x_ref[...]
    # fc1 (f32 accumulation on the MXU) + bias
    h = jnp.dot(x, w1_ref[...], preferred_element_type=jnp.float32)
    h = h + b1_ref[...]
    # QuickGELU: x * sigmoid(1.702 * x)  (sigmoid rides the EUP slot)
    h = h * jax.nn.sigmoid(1.702 * h)
    # fc2 + bias
    y = jnp.dot(h.astype(w2_ref.dtype), w2_ref[...],
                preferred_element_type=jnp.float32)
    y = y + b2_ref[...]
    o_ref[...] = y.astype(o_ref.dtype)


def _token_mlp_itiled_kernel(x_ref, w1_ref, b1_ref, w2_ref, b2_ref, o_ref,
                             acc_ref):
    # Reduction over the intermediate dimension I (grid axis 1, "arbitrary").
    # x_ref: (tm, Hp); w1_ref: (Hp, ti); b1_ref: (1, ti) f32;
    # w2_ref: (ti, Hp); b2_ref: (1, Hp) f32; o_ref: (tm, Hp);
    # acc_ref: (tm, Hp) f32 scratch.
    it = pl.program_id(1)

    @pl.when(it == 0)
    def _():
        acc_ref[...] = jnp.zeros_like(acc_ref)

    h = jnp.dot(x_ref[...], w1_ref[...], preferred_element_type=jnp.float32)
    h = h + b1_ref[...]
    h = h * jax.nn.sigmoid(1.702 * h)          # elementwise per I-feature
    acc_ref[...] += jnp.dot(h.astype(w2_ref.dtype), w2_ref[...],
                            preferred_element_type=jnp.float32)

    @pl.when(it == pl.num_programs(1) - 1)
    def _():
        o_ref[...] = (acc_ref[...] + b2_ref[...]).astype(o_ref.dtype)


# ----------------------------------------------------------------------------
# Tiling heuristics
# ----------------------------------------------------------------------------

def _choose_tm(avail_bytes, per_row_bytes, M, tm_max):
    tm = int(max(8, min(tm_max, avail_bytes // per_row_bytes)))
    if tm >= 256:
        tm = _align_down(tm, 256)      # keep the 256x256 MXU (v6e/v7x) fully fed
    else:
        tm = max(8, _align_down(tm, 8))
    if M <= tm:
        if M >= 512:
            # Keep >= 2 tiles so the "parallel" axis can shard across v7x's 2 TCs.
            return _round_up((M + 1) // 2, 256)
        return _round_up(M, 8)
    # Prefer a tile that divides M exactly (avoids padding M -> no extra HBM copies).
    align = 256 if tm >= 256 else 8
    for cand in range(tm, max(align, tm // 2) - 1, -align):
        if M % cand == 0:
            return cand
    return tm


# ----------------------------------------------------------------------------
# Wrapper
# ----------------------------------------------------------------------------

def token_mlp(hidden_states, w1, b1, w2, b2, *,
              compute_dtype=jnp.bfloat16,
              tm_max=1024, ti_max=512,
              vmem_budget_bytes=None,
              force_path=None):
    """TOKEN_MLP forward: fc2(QuickGELU(fc1(hidden_states))).

    hidden_states: (B, S, H).  w1: (H, I), b1: (I,), w2: (I, H), b2: (H,).
    Weights are stored transposed vs. torch.nn.Linear (i.e. (in, out)), so the
    kernel computes y = x @ W + b directly.

    compute_dtype: dtype fed to the MXU (bf16 by default — native on v6e/v7x).
    Both matmuls accumulate in f32; the output keeps hidden_states.dtype.
    force_path: None | "resident" | "itiled" (testing/benchmarking hook).
    """
    B, S, H = hidden_states.shape
    I = w1.shape[1]
    M = B * S
    out_dtype = hidden_states.dtype
    osize = jnp.dtype(out_dtype).itemsize
    csize = jnp.dtype(compute_dtype).itemsize

    # --- generation-aware VMEM budget / limit --------------------------------
    vmem_cap = _vmem_capacity_bytes()
    if vmem_budget_bytes is None:
        # ~96 MiB on v5e/v6e (128 MiB physical), ~48 MiB on v7x (64 MiB).
        vmem_budget_bytes = int(vmem_cap * 0.75)
    vmem_ceiling = int(vmem_cap * 0.8)           # headroom for compiler scratch
    budget = min(int(vmem_budget_bytes), vmem_ceiling)

    # --- feature dims padded to full lane width ------------------------------
    Hp = _round_up(H, 128)
    Ip = _round_up(I, 128)

    # --- pick path: weights resident vs. I-tiled reduction -------------------
    # Pallas double-buffers every input by default, so the real resident weight
    # footprint is ~2x the raw size.
    resident_w_bytes = 2 * (Hp * Ip + Ip * Hp) * csize + 2 * (Ip + Hp) * 4
    per_row_res = (2 * Hp * csize      # x tile, double-buffered
                   + 2 * Hp * osize    # out tile, double-buffered
                   + Ip * 4            # f32 fc1 intermediate
                   + Hp * 4)           # f32 fc2 pre-cast output
    resident_fits = (resident_w_bytes <= budget // 2
                     and budget - resident_w_bytes >= 8 * per_row_res)
    if force_path == "resident":
        use_itiled = False
    elif force_path == "itiled":
        use_itiled = True
    else:
        use_itiled = not resident_fits

    # --- operands in compute dtype; zero-pad only if actually needed ---------
    x2d = hidden_states.reshape(M, H).astype(compute_dtype)
    w1c = w1.astype(compute_dtype)
    w2c = w2.astype(compute_dtype)
    b1f = b1.reshape(1, I).astype(jnp.float32)   # added to the f32 accumulator
    b2f = b2.reshape(1, H).astype(jnp.float32)

    def maybe_pad(a, rows, cols):
        r, c = a.shape
        if r == rows and c == cols:
            return a
        return jnp.pad(a, ((0, rows - r), (0, cols - c)))

    flops = 4 * M * Hp * Ip                       # two matmuls

    if not use_itiled:
        # ------------------------- resident-weights path ---------------------
        avail = max(budget - resident_w_bytes, 8 * per_row_res)
        tm = _choose_tm(avail, per_row_res, M, tm_max)
        Mp = _round_up(M, tm)

        x_p = maybe_pad(x2d, Mp, Hp)
        w1_p = maybe_pad(w1c, Hp, Ip)
        b1_p = maybe_pad(b1f, 1, Ip)
        w2_p = maybe_pad(w2c, Ip, Hp)
        b2_p = maybe_pad(b2f, 1, Hp)

        footprint = resident_w_bytes + tm * per_row_res
        vmem_limit = int(min(max(footprint * 1.3, 16 * 1024 * 1024),
                             vmem_ceiling))

        cost = pl.CostEstimate(
            flops=flops,
            transcendentals=Mp * Ip,
            bytes_accessed=(Mp * Hp * csize
                            + (Hp * Ip + Ip * Hp) * csize
                            + (Ip + Hp) * 4
                            + Mp * Hp * osize))

        out2d = pl.pallas_call(
            _token_mlp_resident_kernel,
            out_shape=jax.ShapeDtypeStruct((Mp, Hp), out_dtype),
            grid_spec=pltpu.PrefetchScalarGridSpec(
                num_scalar_prefetch=0,
                grid=(Mp // tm,),
                in_specs=[
                    pl.BlockSpec((tm, Hp), lambda i: (i, 0)),    # x tile
                    pl.BlockSpec((Hp, Ip), lambda i: (0, 0)),    # w1 (resident)
                    pl.BlockSpec((1, Ip), lambda i: (0, 0)),     # b1 (resident)
                    pl.BlockSpec((Ip, Hp), lambda i: (0, 0)),    # w2 (resident)
                    pl.BlockSpec((1, Hp), lambda i: (0, 0)),     # b2 (resident)
                ],
                out_specs=pl.BlockSpec((tm, Hp), lambda i: (i, 0)),
            ),
            compiler_params=pltpu.CompilerParams(
                dimension_semantics=("parallel",),
                vmem_limit_bytes=vmem_limit,
            ),
            cost_estimate=cost,
        )(x_p, w1_p, b1_p, w2_p, b2_p)

    else:
        # --------------------------- I-tiled path -----------------------------
        ti = min(int(ti_max), Ip)
        ti = max(128, _align_down(ti, 128))
        # Shrink ti until the double-buffered weight blocks fit half the budget.
        while ti > 128 and 4 * Hp * ti * csize > budget // 2:
            ti = max(128, _align_down(ti - 128, 128))
        Ipb = _round_up(Ip, ti)                   # zero-padded I is inert

        w_block_bytes = 4 * Hp * ti * csize + 2 * ti * 4 + 2 * Hp * 4
        per_row_it = (2 * Hp * csize    # x tile, double-buffered
                      + 2 * Hp * osize  # out tile, double-buffered
                      + Hp * 4          # f32 accumulator scratch
                      + ti * 4)         # f32 fc1 intermediate block
        avail = max(budget - w_block_bytes, 8 * per_row_it)
        tm = _choose_tm(avail, per_row_it, M, tm_max)
        Mp = _round_up(M, tm)

        x_p = maybe_pad(x2d, Mp, Hp)
        w1_p = maybe_pad(w1c, Hp, Ipb)
        b1_p = maybe_pad(b1f, 1, Ipb)
        w2_p = maybe_pad(w2c, Ipb, Hp)
        b2_p = maybe_pad(b2f, 1, Hp)

        footprint = w_block_bytes + tm * per_row_it
        vmem_limit = int(min(max(footprint * 1.3, 16 * 1024 * 1024),
                             vmem_ceiling))

        cost = pl.CostEstimate(
            flops=flops,
            transcendentals=Mp * Ipb,
            bytes_accessed=(Mp * Hp * csize
                            + (Mp // tm) * (Hp * Ipb + Ipb * Hp) * csize
                            + (Ipb + Hp) * 4
                            + Mp * Hp * osize))

        out2d = pl.pallas_call(
            _token_mlp_itiled_kernel,
            out_shape=jax.ShapeDtypeStruct((Mp, Hp), out_dtype),
            grid_spec=pltpu.PrefetchScalarGridSpec(
                num_scalar_prefetch=0,
                grid=(Mp // tm, Ipb // ti),
                in_specs=[
                    pl.BlockSpec((tm, Hp), lambda i, k: (i, 0)),   # x tile
                    pl.BlockSpec((Hp, ti), lambda i, k: (0, k)),   # w1 block
                    pl.BlockSpec((1, ti), lambda i, k: (0, k)),    # b1 block
                    pl.BlockSpec((ti, Hp), lambda i, k: (k, 0)),   # w2 block
                    pl.BlockSpec((1, Hp), lambda i, k: (0, 0)),    # b2
                ],
                out_specs=pl.BlockSpec((tm, Hp), lambda i, k: (i, 0)),
                scratch_shapes=[pltpu.VMEM((tm, Hp), jnp.float32)],
            ),
            compiler_params=pltpu.CompilerParams(
                dimension_semantics=("parallel", "arbitrary"),
                vmem_limit_bytes=vmem_limit,
            ),
            cost_estimate=cost,
        )(x_p, w1_p, b1_p, w2_p, b2_p)

    if Mp == M and Hp == H:
        return out2d.reshape(B, S, H)
    return out2d[:M, :H].reshape(B, S, H)


def reference_token_mlp(hidden_states, w1, b1, w2, b2):
    h = jnp.dot(hidden_states, w1) + b1
    h = h * jax.nn.sigmoid(1.702 * h)
    return jnp.dot(h, w2) + b2


if __name__ == "__main__":
    # Small deterministic setup consistent with TOKEN_MLP(hidden_size, intermediate_size)
    batch, seq, hidden_size, intermediate_size = 2, 8, 32, 64

    key = jax.random.PRNGKey(0)
    kx, kw1, kb1, kw2, kb2, kw3, kb3, kw4, kb4 = jax.random.split(key, 9)

    x = jax.random.normal(kx, (batch, seq, hidden_size), dtype=jnp.float32)
    # PyTorch Linear weight is (out, in); we store the transposed (in, out) layout.
    w1 = jax.random.normal(kw1, (hidden_size, intermediate_size),
                           dtype=jnp.float32) * 0.05
    b1 = jax.random.normal(kb1, (intermediate_size,), dtype=jnp.float32) * 0.05
    w2 = jax.random.normal(kw2, (intermediate_size, hidden_size),
                           dtype=jnp.float32) * 0.05
    b2 = jax.random.normal(kb2, (hidden_size,), dtype=jnp.float32) * 0.05

    ref = reference_token_mlp(x, w1, b1, w2, b2)

    # 1) f32-compute resident path: tight numerical check of kernel structure.
    out_f32 = token_mlp(x, w1, b1, w2, b2, compute_dtype=jnp.float32)
    out_f32 = jax.block_until_ready(out_f32)
    assert out_f32.shape == (batch, seq, hidden_size)
    assert jnp.allclose(out_f32, ref, atol=1e-5, rtol=1e-5)

    # 2) Default bf16-compute path (MXU-native on v6e/v7x): relaxed tolerance.
    out_bf16 = token_mlp(x, w1, b1, w2, b2)
    out_bf16 = jax.block_until_ready(out_bf16)
    assert out_bf16.shape == (batch, seq, hidden_size)
    assert jnp.allclose(out_bf16, ref, atol=5e-2, rtol=5e-2)

    # 3) Exercise the I-tiled fallback (large-weight) path with a multi-step
    #    reduction over the intermediate dim (I=384, ti=128 -> 3 steps).
    inter2 = 384
    w1b = jax.random.normal(kw3, (hidden_size, inter2), dtype=jnp.float32) * 0.05
    b1b = jax.random.normal(kb3, (inter2,), dtype=jnp.float32) * 0.05
    w2b = jax.random.normal(kw4, (inter2, hidden_size), dtype=jnp.float32) * 0.05
    b2b = jax.random.normal(kb4, (hidden_size,), dtype=jnp.float32) * 0.05
    ref_it = reference_token_mlp(x, w1b, b1b, w2b, b2b)
    out_it = token_mlp(x, w1b, b1b, w2b, b2b, compute_dtype=jnp.float32,
                       force_path="itiled", ti_max=128)
    out_it = jax.block_until_ready(out_it)
    assert out_it.shape == (batch, seq, hidden_size)
    assert jnp.allclose(out_it, ref_it, atol=2e-4, rtol=2e-4)

    print("KERNEL_OK")
</pallas_src>

<mosaic_0001>
module attributes {stable_mosaic.version = 11 : i64} {
  func.func @_token_mlp_resident_kernel(%arg0: i32, %arg1: memref<16x128xf32, #tpu.memory_space<vmem>>, %arg2: memref<128x128xf32, #tpu.memory_space<vmem>>, %arg3: memref<1x128xf32, #tpu.memory_space<vmem>>, %arg4: memref<128x128xf32, #tpu.memory_space<vmem>>, %arg5: memref<1x128xf32, #tpu.memory_space<vmem>>, %arg6: memref<16x128xf32, #tpu.memory_space<vmem>>) attributes {dimension_semantics = [#tpu.dimension_semantics<parallel>], iteration_bounds = array<i64: 1>, scalar_prefetch = 0 : i64, scratch_operands = 0 : i64, tpu.core_type = #tpu.core_type<tc>, window_params = [{transform_indices = @transform_0, window_bounds = array<i64: 16, 128>}, {pipeline_mode = #tpu.pipeline_mode<synchronous>, transform_indices = @transform_1, window_bounds = array<i64: 128, 128>}, {pipeline_mode = #tpu.pipeline_mode<synchronous>, transform_indices = @transform_2, window_bounds = array<i64: 1, 128>}, {pipeline_mode = #tpu.pipeline_mode<synchronous>, transform_indices = @transform_3, window_bounds = array<i64: 128, 128>}, {pipeline_mode = #tpu.pipeline_mode<synchronous>, transform_indices = @transform_4, window_bounds = array<i64: 1, 128>}, {transform_indices = @transform_5, window_bounds = array<i64: 16, 128>}]} {
    %c0 = arith.constant 0 : index
    %c0_0 = arith.constant 0 : index
    %0 = vector.load %arg1[%c0, %c0_0] : memref<16x128xf32, #tpu.memory_space<vmem>>, vector<16x128xf32>
    %c0_1 = arith.constant 0 : index
    %c0_2 = arith.constant 0 : index
    %1 = vector.load %arg2[%c0_1, %c0_2] : memref<128x128xf32, #tpu.memory_space<vmem>>, vector<128x128xf32>
    %cst = arith.constant dense<0.000000e+00> : vector<16x128xf32>
    %2 = tpu.matmul %0, %1, %cst {dimension_numbers = #tpu.dot_dimension_numbers<[1], [0], [0], [1], [0, 0, 1, 1], [], []>} : vector<16x128xf32>, vector<128x128xf32>, vector<16x128xf32> -> vector<16x128xf32>
    %c0_3 = arith.constant 0 : index
    %c0_4 = arith.constant 0 : index
    %3 = vector.load %arg3[%c0_3, %c0_4] : memref<1x128xf32, #tpu.memory_space<vmem>>, vector<1x128xf32>
    %4 = vector.broadcast %3 : vector<1x128xf32> to vector<16x128xf32>
    %5 = arith.addf %2, %4 : vector<16x128xf32>
    %cst_5 = arith.constant 1.702000e+00 : f32
    %6 = vector.broadcast %cst_5 : f32 to vector<16x128xf32>
    %7 = arith.mulf %6, %5 : vector<16x128xf32>
    %8 = arith.negf %7 : vector<16x128xf32>
    %9 = math.exp %8 : vector<16x128xf32>
    %cst_6 = arith.constant 1.000000e+00 : f32
    %10 = vector.broadcast %cst_6 : f32 to vector<16x128xf32>
    %11 = arith.addf %10, %9 : vector<16x128xf32>
    %12 = arith.divf %10, %11 : vector<16x128xf32>
    %13 = arith.mulf %5, %12 : vector<16x128xf32>
    %c0_7 = arith.constant 0 : index
    %c0_8 = arith.constant 0 : index
    %14 = vector.load %arg4[%c0_7, %c0_8] : memref<128x128xf32, #tpu.memory_space<vmem>>, vector<128x128xf32>
    %cst_9 = arith.constant dense<0.000000e+00> : vector<16x128xf32>
    %15 = tpu.matmul %13, %14, %cst_9 {dimension_numbers = #tpu.dot_dimension_numbers<[1], [0], [0], [1], [0, 0, 1, 1], [], []>} : vector<16x128xf32>, vector<128x128xf32>, vector<16x128xf32> -> vector<16x128xf32>
    %c0_10 = arith.constant 0 : index
    %c0_11 = arith.constant 0 : index
    %16 = vector.load %arg5[%c0_10, %c0_11] : memref<1x128xf32, #tpu.memory_space<vmem>>, vector<1x128xf32>
    %17 = vector.broadcast %16 : vector<1x128xf32> to vector<16x128xf32>
    %18 = arith.addf %15, %17 : vector<16x128xf32>
    %c0_12 = arith.constant 0 : index
    %c0_13 = arith.constant 0 : index
    %19 = vector.load %arg6[%c0_12, %c0_13] : memref<16x128xf32, #tpu.memory_space<vmem>>, vector<16x128xf32>
    tpu.vector_store %arg6[%c0_12, %c0_13], %18 {strides = array<i32>} : memref<16x128xf32, #tpu.memory_space<vmem>>, vector<16x128xf32>,
    return
  }
  func.func @transform_0(%arg0: i32) -> (i32, i32) {
    %c0_i32 = arith.constant 0 : i32
    %c0_i32_0 = arith.constant 0 : i32
    return %arg0, %c0_i32 : i32, i32
  }
  func.func @transform_1(%arg0: i32) -> (i32, i32) {
    %c0_i32 = arith.constant 0 : i32
    %c0_i32_0 = arith.constant 0 : i32
    %c0_i32_1 = arith.constant 0 : i32
    return %c0_i32, %c0_i32_0 : i32, i32
  }
  func.func @transform_2(%arg0: i32) -> (i32, i32) {
    %c0_i32 = arith.constant 0 : i32
    %c0_i32_0 = arith.constant 0 : i32
    %c0_i32_1 = arith.constant 0 : i32
    return %c0_i32, %c0_i32_0 : i32, i32
  }
  func.func @transform_3(%arg0: i32) -> (i32, i32) {
    %c0_i32 = arith.constant 0 : i32
    %c0_i32_0 = arith.constant 0 : i32
    %c0_i32_1 = arith.constant 0 : i32
    return %c0_i32, %c0_i32_0 : i32, i32
  }
  func.func @transform_4(%arg0: i32) -> (i32, i32) {
    %c0_i32 = arith.constant 0 : i32
    %c0_i32_0 = arith.constant 0 : i32
    %c0_i32_1 = arith.constant 0 : i32
    return %c0_i32, %c0_i32_0 : i32, i32
  }
  func.func @transform_5(%arg0: i32) -> (i32, i32) {
    %c0_i32 = arith.constant 0 : i32
    %c0_i32_0 = arith.constant 0 : i32
    return %arg0, %c0_i32 : i32, i32
  }
}

</mosaic_0001>

<bundles_post_ra>
// kernel: tpu_custom_call.1
= control target key start
LH: loop header
LB: loop body
LE: loop exit
PB: predicated region body
PF: predicated region fallthrough
CT: control target
= control target key end

     0   :  { %10 = vsyncpa [#allocation3], 0  ;;  %s687_s0 = inlined_call_operand.hbm [shape: f32[16,128], index: 0, kind: input, shape index: {}]   ;;  %s688_s1 = inlined_call_operand.hbm [shape: f32[128,128], index: 1, kind: input, shape index: {}]   ;;  %s689_s2 = inlined_call_operand.vmem [shape: f32[1,128], index: 2, kind: input, shape index: {}]   ;;  %s690_s3 = inlined_call_operand.hbm [shape: f32[128,128], index: 3, kind: input, shape index: {}]   ;;  %s691_s4 = inlined_call_operand.vmem [shape: f32[1,128], index: 4, kind: input, shape index: {}]   ;;  %s692_s5 = inlined_call_operand.hbm [shape: f32[16,128], index: 5, kind: output, shape index: {}]  }
   0x1   :  { %11 = vsyncpa [#allocation6], 0 }
   0x2   :  { %12 = vsyncpa [#allocation4], 0  ;;  %s578_s18 = smov [#allocation5]   ;;  %s579_s20 = smov [#allocation2]  }
   0x3   :  { %s30_s19 = sshll.u32 %s578_s18, 4  ;;  %s18_s21 = sshll.u32 %s579_s20, 4  ;;  %s31_s19 = int_to_ptr.vmem [resolvable:$true] %s30_s19  ;;  %s614_s21 = int_to_ptr.vmem [resolvable:$true] %s18_s21 }
   0x4   :  { %s484_s24 = scalar_lea.hbm %s688_s1, 2048 }
   0x5   :  { %p485_p0 = scmp.ne.s32.totalorder %s688_s1, %s484_s24  ;;  %p488_p1 = scmp.lt.u32.totalorder %s484_s24, %s688_s1 }
   0x7   :  { %p490_p2 = pnand %p488_p1, %p485_p0 }
   0x9   :  { %493 = shalt.err (!%p490_p2)
}
   0xa   :  { %s494_s29 = scalar_lea.vmem %s31_s19, 2048  ;;  %p499_p4 = scmp.lt.s32.totalorder %s31_s19, %s31_s19 }
   0xb   :  { %p495_p3 = scmp.ne.s32.totalorder %s31_s19, %s494_s29  ;;  %p500_p5 = scmp.lt.s32.totalorder %s494_s29, %s494_s29 }
   0xd   :  { %p501_p6 = por %p500_p5, %p499_p4 }
   0xf   :  { %p502_p7 = pnand %p501_p6, %p495_p3 }
  0x11   :  { %505 = shalt.err (!%p502_p7)
}
  0x12   :  { %s580_s30 = smov 128   ;;  %s581_s6 = smov 8  }
  0x13   :  { %36 = dma.hbm_to_vmem [thread:$0]  %s688_s1, 2048, %s31_s19, [#allocation6], %s580_s30, %s580_s30, %s581_s6  }
  0x14   :  { %s506_s11 = scalar_lea.hbm %s687_s0, 256 }
  0x15   :  { %p507_p8 = scmp.ne.s32.totalorder %s687_s0, %s506_s11  ;;  %p510_p9 = scmp.lt.u32.totalorder %s506_s11, %s687_s0 }
  0x17   :  { %p512_p10 = pnand %p510_p9, %p507_p8 }
  0x19   :  { %515 = shalt.err (!%p512_p10)
}
  0x1a   :  { %s516_s16 = scalar_lea.vmem %s614_s21, 256  ;;  %p521_p12 = scmp.lt.s32.totalorder %s614_s21, %s614_s21 }
  0x1b   :  { %p517_p11 = scmp.ne.s32.totalorder %s614_s21, %s516_s16  ;;  %p522_p13 = scmp.lt.s32.totalorder %s516_s16, %s516_s16 }
  0x1d   :  { %p523_p0 = por %p522_p13, %p521_p12 }
  0x1f   :  { %p524_p1 = pnand %p523_p0, %p517_p11 }
  0x21   :  { %527 = shalt.err (!%p524_p1)
}
  0x22   :  { %24 = dma.hbm_to_vmem [thread:$0]  %s687_s0, 256, %s614_s21, [#allocation3], %s580_s30, %s580_s30, %s581_s6  }
  0x23   :  { %s582_s18 = smov [#allocation7]   ;;  %s528_s23 = scalar_lea.hbm %s690_s3, 2048 }
  0x24   :  { %s44_s19 = sshll.u32 %s582_s18, 4  ;;  %p529_p2 = scmp.ne.s32.totalorder %s690_s3, %s528_s23  ;;  %s45_s19 = int_to_ptr.vmem [resolvable:$true] %s44_s19 }
  0x25   :  { %p532_p3 = scmp.lt.u32.totalorder %s528_s23, %s690_s3 }
  0x27   :  { %p534_p4 = pnand %p532_p3, %p529_p2 }
  0x29   :  { %537 = shalt.err (!%p534_p4)
}
  0x2a   :  { %s538_s28 = scalar_lea.vmem %s45_s19, 2048  ;;  %p543_p6 = scmp.lt.s32.totalorder %s45_s19, %s45_s19 }
  0x2b   :  { %p539_p5 = scmp.ne.s32.totalorder %s45_s19, %s538_s28  ;;  %p544_p7 = scmp.lt.s32.totalorder %s538_s28, %s538_s28 }
  0x2d   :  { %p545_p8 = por %p544_p7, %p543_p6 }
  0x2f   :  { %p546_p9 = pnand %p545_p8, %p539_p5 }
  0x31   :  { %549 = shalt.err (!%p546_p9)
}
  0x32   :  { %50 = dma.hbm_to_vmem [thread:$0]  %s690_s3, 2048, %s45_s19, [#allocation6], %s580_s30, %s580_s30, %s581_s6  }
  0x33   :  { %572 = dma.done.wait [#allocation3], 256  }
  0x34   :  { %573 = vsyncadd [#allocation3], 4294967040 }
  0x35   :  { %574 = dma.done.wait [#allocation6], 4096  }
  0x36   :  { %575 = vsyncadd [#allocation6], 4294963200  ;;  %v64_v0 = vld [vmem:[#allocation5] sm:$0xff]  ;;  %v65_v1 = vld [vmem:[#allocation5 + $0x8] sm:$0xff]  ;;  %s583_s8 = smov [#allocation8]  }
  0x37   :  { %v66_v2 = vld [vmem:[#allocation5 + $0x10] sm:$0xff]  ;;  %v406_v3 = vpack.c.bf16 %v65_v1, %v64_v0  ;;  %v67_v4 = vld [vmem:[#allocation5 + $0x18] sm:$0xff]  ;;  %v68_v6 = vld [vmem:[#allocation5 + $0x20] sm:$0xff]  ;;  %s283_s9 = sshll.u32 %s583_s8, 4  ;;  %s284_s9 = int_to_ptr.vmem [resolvable:$true] %s283_s9 }
  0x38   :  { %v410_v5 = vpack.c.bf16 %v67_v4, %v66_v2  ;;  %v69_v7 = vld [vmem:[#allocation5 + $0x28] sm:$0xff]  ;;  %v62_v9 = vld [vmem:[#allocation2] sm:$0xff]  ;;  %v71_v11 = vld [vmem:[#allocation5 + $0x38] sm:$0xff]  ;;  %s550_s10 = scalar_lea.vmem %s284_s9, 256  ;;  %p555_p11 = scmp.lt.s32.totalorder %s284_s9, %s284_s9 }
  0x39   :  { %407 = vmatprep.subr.bf16.mxu0 %v406_v3  ;;  %v414_v8 = vpack.c.bf16 %v69_v7, %v68_v6  ;;  %v70_v10 = vld [vmem:[#allocation5 + $0x30] sm:$0xff]  ;;  %368 = vmatprep.mubr.f32.mxu0 %v62_v9  ;;  %v72_v13 = vld [vmem:[#allocation5 + $0x40] sm:$0xff]  ;;  %v73_v14 = vld [vmem:[#allocation5 + $0x48] sm:$0xff]  ;;  %p551_p10 = scmp.ne.s32.totalorder %s284_s9, %s550_s10  ;;  %p556_p12 = scmp.lt.s32.totalorder %s550_s10, %s550_s10 }
  0x3a   :  { %409 = vmatpush3.bf16.msra.mxu0 %v406_v3  ;;  %v418_v12 = vpack.c.bf16 %v71_v11, %v70_v10  ;;  %v422_v15 = vpack.c.bf16 %v73_v14, %v72_v13  ;;  %v74_v16 = vld [vmem:[#allocation5 + $0x50] sm:$0xff]  ;;  %v75_v17 = vld [vmem:[#allocation5 + $0x58] sm:$0xff]  ;;  %v76_v19 = vld [vmem:[#allocation5 + $0x60] sm:$0xff] }
  0x3b   :  { %411 = vmatprep.subr.bf16.mxu0 %v410_v5  ;;  %v426_v18 = vpack.c.bf16 %v75_v17, %v74_v16  ;;  %v77_v20 = vld [vmem:[#allocation5 + $0x68] sm:$0xff]  ;;  %v78_v22 = vld [vmem:[#allocation5 + $0x70] sm:$0xff]  ;;  %v79_v23 = vld [vmem:[#allocation5 + $0x78] sm:$0xff]  ;;  %p557_p13 = por %p556_p12, %p555_p11 }
  0x3c   :  { %v430_v21 = vpack.c.bf16 %v77_v20, %v76_v19  ;;  %v434_v24 = vpack.c.bf16 %v79_v23, %v78_v22  ;;  %v63_v25 = vld [vmem:[#allocation2 + $0x8] sm:$0xff]  ;;  %v178_v26 = vld [vmem:[#allocation7] sm:$0xff]  ;;  %v179_v27 = vld [vmem:[#allocation7 + $0x8] sm:$0xff] }
  0x3d   :  { %v438_v28 = vpack.c.bf16 %v179_v27, %v178_v26  ;;  %v180_v29 = vld [vmem:[#allocation7 + $0x10] sm:$0xff]  ;;  %v181_v30 = vld [vmem:[#allocation7 + $0x18] sm:$0xff]  ;;  %v182_v32 = vld [vmem:[#allocation7 + $0x20] sm:$0xff]  ;;  %p558_p0 = pnand %p557_p13, %p551_p10 }
  0x3e   :  { %413 = vmatpush3.bf16.msra.mxu0 %v410_v5  ;;  %v442_v31 = vpack.c.bf16 %v181_v30, %v180_v29  ;;  %v183_v33 = vld [vmem:[#allocation7 + $0x28] sm:$0xff]  ;;  %v184_v35 = vld [vmem:[#allocation7 + $0x30] sm:$0xff]  ;;  %v185_v36 = vld [vmem:[#allocation7 + $0x38] sm:$0xff] }
  0x3f   :  { %415 = vmatprep.subr.bf16.mxu0 %v414_v8  ;;  %439 = vmatprep.subr.bf16.mxu1 %v438_v28  ;;  %v446_v34 = vpack.c.bf16 %v183_v33, %v182_v32  ;;  %v450_v37 = vpack.c.bf16 %v185_v36, %v184_v35  ;;  %v186_v38 = vld [vmem:[#allocation7 + $0x40] sm:$0xff]  ;;  %v187_v39 = vld [vmem:[#allocation7 + $0x48] sm:$0xff]  ;;  %v188_v41 = vld [vmem:[#allocation7 + $0x50] sm:$0xff] }
  0x40   :  { %441 = vmatpush3.bf16.msra.mxu1 %v438_v28  ;;  %v454_v40 = vpack.c.bf16 %v187_v39, %v186_v38  ;;  %v189_v42 = vld [vmem:[#allocation7 + $0x58] sm:$0xff]  ;;  %v190_v44 = vld [vmem:[#allocation7 + $0x60] sm:$0xff]  ;;  %v191_v45 = vld [vmem:[#allocation7 + $0x68] sm:$0xff] }
  0x41   :  { %443 = vmatprep.subr.bf16.mxu1 %v442_v31  ;;  %v458_v43 = vpack.c.bf16 %v189_v42, %v188_v41  ;;  %v462_v46 = vpack.c.bf16 %v191_v45, %v190_v44  ;;  %v192_v47 = vld [vmem:[#allocation7 + $0x70] sm:$0xff]  ;;  %v193_v48 = vld [vmem:[#allocation7 + $0x78] sm:$0xff] }
  0x42   :  { %417 = vmatpush3.bf16.msra.mxu0 %v414_v8  ;;  %v466_v49 = vpack.c.bf16 %v193_v48, %v192_v47  ;;  %v296_v50 = vld [vmem:[%s689_s2] ss:$0 sm:$0xff] }
  0x43   :  { %419 = vmatprep.subr.bf16.mxu0 %v418_v12  ;;  %v299_v3 = vld [vmem:[%s691_s4] ss:$0 sm:$0xff] }
  0x44   :  { %445 = vmatpush3.bf16.msra.mxu1 %v442_v31 }
  0x45   :  { %447 = vmatprep.subr.bf16.mxu1 %v446_v34 }
  0x46   :  { %421 = vmatpush3.bf16.msra.mxu0 %v418_v12 }
  0x47   :  { %423 = vmatprep.subr.bf16.mxu0 %v422_v15 }
  0x48   :  { %449 = vmatpush3.bf16.msra.mxu1 %v446_v34 }
  0x49   :  { %451 = vmatprep.subr.bf16.mxu1 %v450_v37 }
  0x4a   :  { %425 = vmatpush3.bf16.msra.mxu0 %v422_v15 }
  0x4b   :  { %427 = vmatprep.subr.bf16.mxu0 %v426_v18 }
  0x4c   :  { %453 = vmatpush3.bf16.msra.mxu1 %v450_v37 }
  0x4d   :  { %455 = vmatprep.subr.bf16.mxu1 %v454_v40 }
  0x4e   :  { %429 = vmatpush3.bf16.msra.mxu0 %v426_v18 }
  0x4f   :  { %431 = vmatprep.subr.bf16.mxu0 %v430_v21 }
  0x50   :  { %457 = vmatpush3.bf16.msra.mxu1 %v454_v40 }
  0x51   :  { %459 = vmatprep.subr.bf16.mxu1 %v458_v43 }
  0x52   :  { %433 = vmatpush3.bf16.msra.mxu0 %v430_v21 }
  0x53   :  { %435 = vmatprep.subr.bf16.mxu0 %v434_v24 }
  0x54   :  { %461 = vmatpush3.bf16.msra.mxu1 %v458_v43 }
  0x55   :  { %463 = vmatprep.subr.bf16.mxu1 %v462_v46 }
  0x56   :  { %437 = vmatpush3.bf16.msra.mxu0 %v434_v24 }
  0x58   :  { %465 = vmatpush3.bf16.msra.mxu1 %v462_v46 }
  0x59   :  { %369 = vmatmul.mubr.f32.vlgmr.msra.gmra.mrb[0].mxu0 %v63_v25  ;;  %467 = vmatprep.subr.bf16.mxu1 %v466_v49 }
  0x5c   :  { %469 = vmatpush3.bf16.msra.mxu1 %v466_v49 }
 0x12c   :  { %v370_v51 = vpop.f32.mrb[0].mxu0 }
 0x12d   :  { %v159_v52 = vadd.f32 %v370_v51, %v296_v50  ;;  %v153_v53 = vpop.f32.mrb[1].mxu0 }
 0x12e   :  { %v154_v54 = vadd.f32 %v296_v50, %v153_v53 }
 0x12f   :  { %v298_v55 = vmul.f32 -1.702, %v159_v52 }
 0x130   :  { %v297_v56 = vmul.f32 -1.702, %v154_v54 }
 0x131   :  { %v168_v57 = vmul.f32 1.442695, %v298_v55 }
 0x132   :  { %v166_v58 = vmul.f32 1.442695, %v297_v56 }
 0x133   :  { %476 = vpow2.f32 %v168_v57 }
 0x134   :  { %478 = vpow2.f32 %v166_v58 }
 0x13d   :  { %v477_v59 = vpop.eup %476 }
 0x13e   :  { %v479_v60 = vpop.eup %478  ;;  %v171_v61 = vadd.f32 1.0, %v477_v59 }
 0x13f   :  { %v170_v62 = vadd.f32 1.0, %v479_v60 }
 0x140   :  { %480 = vrcp.f32 %v171_v61 }
 0x141   :  { %482 = vrcp.f32 %v170_v62 }
 0x14a   :  { %v481_v63 = vpop.eup %480 }
 0x14b   :  { %v483_v0 = vpop.eup %482  ;;  %v177_v2 = vmul.f32 %v481_v63, %v159_v52 }
 0x14c   :  { %v176_v1 = vmul.f32 %v483_v0, %v154_v54 }
 0x14e   :  { %403 = vmatprep.mubr.f32.mxu1 %v176_v1 }
 0x14f   :  { %404 = vmatmul.mubr.f32.vlgmr.msra.gmra.mrb[0].mxu1 %v177_v2 }
 0x222   :  { %v405_v4 = vpop.f32.mrb[0].mxu1 }
 0x223   :  { %v273_v5 = vadd.f32 %v405_v4, %v299_v3  ;;  %v267_v6 = vpop.f32.mrb[1].mxu1 }
 0x224   :  { %v268_v7 = vadd.f32 %v299_v3, %v267_v6 }
 0x225   :  { %277 = vst [vmem:[#allocation8 + $0x8] sm:$0xff] %v273_v5 }
 0x226   :  { %276 = vst [vmem:[#allocation8] sm:$0xff] %v268_v7 }
 0x227   :  { %561 = shalt.err (!%p558_p0)
}
 0x228   :  { %s562_s4 = scalar_lea.hbm %s692_s5, 256 }
 0x229   :  { %p563_p1 = scmp.ne.s32.totalorder %s692_s5, %s562_s4  ;;  %p566_p2 = scmp.lt.u32.totalorder %s562_s4, %s692_s5 }
 0x22b   :  { %p568_p3 = pnand %p566_p2, %p563_p1 }
 0x22d   :  { %571 = shalt.err (!%p568_p3)
}
 0x22e   :  { %289 = dma.vmem_to_hbm [thread:$0]  %s284_s9, 256, %s692_s5, [#allocation4], %s580_s30, %s580_s30, %s581_s6  }
 0x22f   :  { %576 = dma.done.wait [#allocation4], 256  }
 0x230   :  { %577 = vsyncadd [#allocation4], 4294967040 }
 0x231   :  { %293 = vsyncpa [#allocation3], 1 }
 0x232   :  { %294 = vsyncpa [#allocation6], 1 }
 0x233   :  { %295 = vsyncpa [#allocation4], 1 }

</bundles_post_ra>
